<compile_context>
chip_gen: v7x
topology: tpu7x:2x2x1
jax: 0.10.0
libtpu: 0.0.40
codegen_flags: <defaults>
</compile_context>

<pallas_src>
import jax
import jax.numpy as jnp
from jax.experimental import pallas as pl
from jax.experimental.pallas import tpu as pltpu


_LANE = 128                               # hidden dim padded to this (one-time)
_DEFAULT_VMEM_CAP = 64 * 1024 * 1024      # v7x per-TC VMEM; safe fallback everywhere


def _round_up(x: int, m: int) -> int:
    return ((x + m - 1) // m) * m


def _sublane(dtype) -> int:
    # second-minor granularity: 8 rows for 4-byte, 16 for 2-byte, 32 for 1-byte
    return max(8, 32 // jnp.dtype(dtype).itemsize)


def _vmem_caps():
    """Generation-aware (tile budget, vmem_limit_bytes)."""
    try:
        cap = int(pltpu.get_tpu_info().vmem_capacity_bytes)
    except Exception:  # not on TPU / API unavailable -> assume smallest (v7x: 64 MiB)
        cap = _DEFAULT_VMEM_CAP
    budget = int(cap * 0.70)                          # headroom for Mosaic scratch
    limit = min(int(cap * 0.90), cap - (4 << 20))     # above 16/32 MiB scoped defaults
    return budget, limit


def _vmem_estimate(tile_m, d_in, h, d_out, x_bytes, w_bytes, out_bytes,
                   weight_bufs=1):
    x_tiles = 2 * tile_m * d_in * x_bytes          # double-buffered x tile
    o_tiles = 2 * tile_m * d_out * out_bytes       # double-buffered out tile
    weights = weight_bufs * (d_in * h + h * d_out) * w_bytes   # Buffered(1) -> 1x
    biases = weight_bufs * (h + d_out) * 4
    inter = tile_m * h * (4 + w_bytes)             # f32 hidden + compute-dtype copy
    return x_tiles + o_tiles + weights + biases + inter


def mlp_kernel(x_ref, w1_ref, b1_ref, w2_ref, b2_ref, o_ref):
    # out = relu(x @ W1 + b1) @ W2 + b2; MXU matmuls with f32 accumulation.
    # x is cast to the weights' compute dtype here (no extra HBM pass over x).
    x = x_ref[...].astype(w1_ref.dtype)
    h = jnp.dot(x, w1_ref[...], preferred_element_type=jnp.float32)
    h = jnp.maximum(h + b1_ref[...], 0.0)
    o = jnp.dot(h.astype(w2_ref.dtype), w2_ref[...],
                preferred_element_type=jnp.float32)
    o_ref[...] = (o + b2_ref[...]).astype(o_ref.dtype)


def prepare_mlp_params(w1, b1, w2, b2, *, compute_dtype=jnp.bfloat16):
    """One-time weight prep (hoisted out of the per-call forward path).

    w1: (D_in, H), b1: (H,), w2: (H, D_out), b2: (D_out,).
    Only the hidden dim is padded (to a multiple of 128); zero columns are
    inert through ReLU and the second matmul. D_in / D_out stay unpadded.
    """
    d_in, h = w1.shape
    d_out = w2.shape[1]
    assert w2.shape[0] == h and b1.shape == (h,) and b2.shape == (d_out,)
    h_p = _round_up(h, _LANE)
    w1p = jnp.pad(w1, ((0, 0), (0, h_p - h))).astype(compute_dtype)
    w2p = jnp.pad(w2, ((0, h_p - h), (0, 0))).astype(compute_dtype)
    b1p = jnp.pad(b1, (0, h_p - h)).reshape(1, h_p).astype(jnp.float32)
    b2p = b2.reshape(1, d_out).astype(jnp.float32)
    return dict(w1=w1p, b1=b1p, w2=w2p, b2=b2p, d_in=d_in, d_out=d_out, h_p=h_p)


def _build_call(tile_m, grid_m, b_p, d_in, h_p, d_out, out_dtype,
                vmem_limit, cost, buffered_weights):
    # Grid-invariant operands need only a single VMEM buffer.
    wkw = {"pipeline_mode": pl.Buffered(1)} if buffered_weights else {}
    return pl.pallas_call(
        mlp_kernel,
        out_shape=jax.ShapeDtypeStruct((b_p, d_out), out_dtype),
        grid_spec=pltpu.PrefetchScalarGridSpec(
            num_scalar_prefetch=0,
            grid=(grid_m,),
            in_specs=[
                pl.BlockSpec((tile_m, d_in), lambda i: (i, 0)),       # x tile (unpadded K)
                pl.BlockSpec((d_in, h_p), lambda i: (0, 0), **wkw),   # W1 (resident)
                pl.BlockSpec((1, h_p), lambda i: (0, 0), **wkw),      # b1
                pl.BlockSpec((h_p, d_out), lambda i: (0, 0), **wkw),  # W2 (resident)
                pl.BlockSpec((1, d_out), lambda i: (0, 0), **wkw),    # b2
            ],
            out_specs=pl.BlockSpec((tile_m, d_out), lambda i: (i, 0)),
        ),
        compiler_params=pltpu.CompilerParams(
            dimension_semantics=("parallel",),   # batch grid shards across v7x TCs
            vmem_limit_bytes=vmem_limit,
        ),
        cost_estimate=cost,
    )


def mlp_forward(x, params, *, out_dtype=jnp.float32, max_tile_m=2048):
    """x: (..., D_in) -> (..., D_out). `params` from prepare_mlp_params.

    out_dtype=jnp.bfloat16 halves the HBM writeback if the caller tolerates it.
    """
    w1p, b1p, w2p, b2p = params["w1"], params["b1"], params["w2"], params["b2"]
    d_in, d_out, h_p = params["d_in"], params["d_out"], params["h_p"]
    assert x.shape[-1] == d_in

    lead = x.shape[:-1]
    x2 = x.reshape(-1, d_in)
    B = x2.shape[0]

    x_bytes = jnp.dtype(x2.dtype).itemsize
    w_bytes = jnp.dtype(w1p.dtype).itemsize
    o_bytes = jnp.dtype(out_dtype).itemsize

    budget, vmem_limit = _vmem_caps()
    sub = max(_sublane(x2.dtype), _sublane(out_dtype))   # sublane, not lane, alignment

    # Batch tile: as large as the VMEM budget allows (no 128-row floor); keep
    # >= 2 grid steps for large batches so both v7x TensorCores get work.
    tile_m = min(max(max_tile_m, sub), _round_up(B, sub))
    if B > 1024:
        tile_m = min(tile_m, _round_up(pl.cdiv(B, 2), sub))
    while tile_m > sub and _vmem_estimate(tile_m, d_in, h_p, d_out,
                                          x_bytes, w_bytes, o_bytes) > budget:
        tile_m = max(sub, _round_up(tile_m // 2, sub))

    if tile_m >= B:
        tile_m, b_p, grid_m = B, B, 1    # single block == full array dims; no padding
        xp = x2
    else:
        b_p = _round_up(B, tile_m)
        grid_m = b_p // tile_m
        xp = jnp.pad(x2, ((0, b_p - B), (0, 0))) if b_p != B else x2

    cost = pl.CostEstimate(
        flops=2 * b_p * (d_in * h_p + h_p * d_out),
        transcendentals=0,
        bytes_accessed=(b_p * d_in * x_bytes
                        + (d_in * h_p + h_p * d_out) * w_bytes
                        + (h_p + d_out) * 4
                        + b_p * d_out * o_bytes),
    )

    args = (xp, w1p, b1p, w2p, b2p)
    try:
        out_p = _build_call(tile_m, grid_m, b_p, d_in, h_p, d_out, out_dtype,
                            vmem_limit, cost, buffered_weights=True)(*args)
    except Exception:
        # JAX build without pipeline_mode=Buffered support: default buffering.
        out_p = _build_call(tile_m, grid_m, b_p, d_in, h_p, d_out, out_dtype,
                            vmem_limit, cost, buffered_weights=False)(*args)

    out = out_p[:B] if b_p != B else out_p          # padded rows are discarded
    return out.reshape(*lead, d_out)


def init_mlp_params(key, input_dim, output_dim, hidden_dim=256):
    # Matches nn.init.uniform_(weight, -0.001, 0.001) and zero biases.
    k1, k2 = jax.random.split(key)
    # PyTorch weight is (out, in); store transposed (in, out) for the kernel.
    w1 = jax.random.uniform(k1, (hidden_dim, input_dim), jnp.float32,
                            minval=-0.001, maxval=0.001).T
    b1 = jnp.zeros((hidden_dim,), jnp.float32)
    w2 = jax.random.uniform(k2, (output_dim, hidden_dim), jnp.float32,
                            minval=-0.001, maxval=0.001).T
    b2 = jnp.zeros((output_dim,), jnp.float32)
    return w1, b1, w2, b2


if __name__ == "__main__":
    key = jax.random.PRNGKey(0)
    kx, kp = jax.random.split(key)

    batch, input_dim, hidden_dim, output_dim = 8, 32, 256, 16
    x = jax.random.normal(kx, (batch, input_dim), jnp.float32)
    w1, b1, w2, b2 = init_mlp_params(kp, input_dim, output_dim, hidden_dim)

    # Full-f32 PyTorch-equivalent reference.
    ref_f32 = jnp.maximum(x @ w1 + b1, 0.0) @ w2 + b2

    # --- Default bf16 compute path (MXU-native inputs, f32 accumulation). ---
    params_bf16 = prepare_mlp_params(w1, b1, w2, b2, compute_dtype=jnp.bfloat16)
    out_bf16 = jax.block_until_ready(mlp_forward(x, params_bf16))
    assert out_bf16.shape == (batch, output_dim)

    h_ref = jnp.maximum(
        jnp.dot(x.astype(jnp.bfloat16), w1.astype(jnp.bfloat16),
                preferred_element_type=jnp.float32) + b1, 0.0)
    ref_bf16 = jnp.dot(h_ref.astype(jnp.bfloat16), w2.astype(jnp.bfloat16),
                       preferred_element_type=jnp.float32) + b2
    assert jnp.allclose(out_bf16, ref_bf16, atol=1e-6, rtol=1e-2), \
        float(jnp.max(jnp.abs(out_bf16 - ref_bf16)))
    assert jnp.allclose(out_bf16, ref_f32, atol=1e-6, rtol=5e-2), \
        float(jnp.max(jnp.abs(out_bf16 - ref_f32)))

    # --- f32 compute path (bit-faithful to the PyTorch module's math). ---
    params_f32 = prepare_mlp_params(w1, b1, w2, b2, compute_dtype=jnp.float32)
    out_f32 = jax.block_until_ready(mlp_forward(x, params_f32))
    assert out_f32.shape == (batch, output_dim)
    assert jnp.allclose(out_f32, ref_f32, atol=1e-6, rtol=1e-2), \
        float(jnp.max(jnp.abs(out_f32 - ref_f32)))

    print("KERNEL_OK")
</pallas_src>

<mosaic_0001>
module attributes {stable_mosaic.version = 11 : i64} {
  func.func @mlp_kernel(%arg0: i32, %arg1: memref<8x32xf32, #tpu.memory_space<vmem>>, %arg2: memref<32x256xbf16, #tpu.memory_space<vmem>>, %arg3: memref<1x256xf32, #tpu.memory_space<vmem>>, %arg4: memref<256x16xbf16, #tpu.memory_space<vmem>>, %arg5: memref<1x16xf32, #tpu.memory_space<vmem>>, %arg6: memref<8x16xf32, #tpu.memory_space<vmem>>) attributes {dimension_semantics = [#tpu.dimension_semantics<parallel>], iteration_bounds = array<i64: 1>, scalar_prefetch = 0 : i64, scratch_operands = 0 : i64, tpu.core_type = #tpu.core_type<tc>, window_params = [{transform_indices = @transform_0, window_bounds = array<i64: 8, 32>}, {pipeline_mode = #tpu.pipeline_mode<synchronous>, transform_indices = @transform_1, window_bounds = array<i64: 32, 256>}, {pipeline_mode = #tpu.pipeline_mode<synchronous>, transform_indices = @transform_2, window_bounds = array<i64: 1, 256>}, {pipeline_mode = #tpu.pipeline_mode<synchronous>, transform_indices = @transform_3, window_bounds = array<i64: 256, 16>}, {pipeline_mode = #tpu.pipeline_mode<synchronous>, transform_indices = @transform_4, window_bounds = array<i64: 1, 16>}, {transform_indices = @transform_5, window_bounds = array<i64: 8, 16>}]} {
    %c0 = arith.constant 0 : index
    %c0_0 = arith.constant 0 : index
    %0 = vector.load %arg1[%c0, %c0_0] : memref<8x32xf32, #tpu.memory_space<vmem>>, vector<8x32xf32>
    %1 = arith.truncf %0 : vector<8x32xf32> to vector<8x32xbf16>
    %c0_1 = arith.constant 0 : index
    %c0_2 = arith.constant 0 : index
    %2 = vector.load %arg2[%c0_1, %c0_2] : memref<32x256xbf16, #tpu.memory_space<vmem>>, vector<32x256xbf16>
    %cst = arith.constant dense<0.000000e+00> : vector<8x256xf32>
    %3 = tpu.matmul %1, %2, %cst {dimension_numbers = #tpu.dot_dimension_numbers<[1], [0], [0], [1], [0, 0, 1, 1], [], []>} : vector<8x32xbf16>, vector<32x256xbf16>, vector<8x256xf32> -> vector<8x256xf32>
    %c0_3 = arith.constant 0 : index
    %c0_4 = arith.constant 0 : index
    %4 = vector.load %arg3[%c0_3, %c0_4] : memref<1x256xf32, #tpu.memory_space<vmem>>, vector<1x256xf32>
    %5 = vector.broadcast %4 : vector<1x256xf32> to vector<8x256xf32>
    %6 = arith.addf %3, %5 : vector<8x256xf32>
    %cst_5 = arith.constant 0.000000e+00 : f32
    %7 = vector.broadcast %cst_5 : f32 to vector<8x256xf32>
    %8 = arith.maximumf %6, %7 : vector<8x256xf32>
    %9 = arith.truncf %8 : vector<8x256xf32> to vector<8x256xbf16>
    %c0_6 = arith.constant 0 : index
    %c0_7 = arith.constant 0 : index
    %10 = vector.load %arg4[%c0_6, %c0_7] : memref<256x16xbf16, #tpu.memory_space<vmem>>, vector<256x16xbf16>
    %cst_8 = arith.constant dense<0.000000e+00> : vector<8x16xf32>
    %11 = tpu.matmul %9, %10, %cst_8 {dimension_numbers = #tpu.dot_dimension_numbers<[1], [0], [0], [1], [0, 0, 1, 1], [], []>} : vector<8x256xbf16>, vector<256x16xbf16>, vector<8x16xf32> -> vector<8x16xf32>
    %c0_9 = arith.constant 0 : index
    %c0_10 = arith.constant 0 : index
    %12 = vector.load %arg5[%c0_9, %c0_10] : memref<1x16xf32, #tpu.memory_space<vmem>>, vector<1x16xf32>
    %13 = vector.broadcast %12 : vector<1x16xf32> to vector<8x16xf32>
    %14 = arith.addf %11, %13 : vector<8x16xf32>
    %c0_11 = arith.constant 0 : index
    %c0_12 = arith.constant 0 : index
    %15 = vector.load %arg6[%c0_11, %c0_12] : memref<8x16xf32, #tpu.memory_space<vmem>>, vector<8x16xf32>
    tpu.vector_store %arg6[%c0_11, %c0_12], %14 {strides = array<i32>} : memref<8x16xf32, #tpu.memory_space<vmem>>, vector<8x16xf32>,
    return
  }
  func.func @transform_0(%arg0: i32) -> (i32, i32) {
    %c0_i32 = arith.constant 0 : i32
    %c0_i32_0 = arith.constant 0 : i32
    return %arg0, %c0_i32 : i32, i32
  }
  func.func @transform_1(%arg0: i32) -> (i32, i32) {
    %c0_i32 = arith.constant 0 : i32
    %c0_i32_0 = arith.constant 0 : i32
    %c0_i32_1 = arith.constant 0 : i32
    return %c0_i32, %c0_i32_0 : i32, i32
  }
  func.func @transform_2(%arg0: i32) -> (i32, i32) {
    %c0_i32 = arith.constant 0 : i32
    %c0_i32_0 = arith.constant 0 : i32
    %c0_i32_1 = arith.constant 0 : i32
    return %c0_i32, %c0_i32_0 : i32, i32
  }
  func.func @transform_3(%arg0: i32) -> (i32, i32) {
    %c0_i32 = arith.constant 0 : i32
    %c0_i32_0 = arith.constant 0 : i32
    %c0_i32_1 = arith.constant 0 : i32
    return %c0_i32, %c0_i32_0 : i32, i32
  }
  func.func @transform_4(%arg0: i32) -> (i32, i32) {
    %c0_i32 = arith.constant 0 : i32
    %c0_i32_0 = arith.constant 0 : i32
    %c0_i32_1 = arith.constant 0 : i32
    return %c0_i32, %c0_i32_0 : i32, i32
  }
  func.func @transform_5(%arg0: i32) -> (i32, i32) {
    %c0_i32 = arith.constant 0 : i32
    %c0_i32_0 = arith.constant 0 : i32
    return %arg0, %c0_i32 : i32, i32
  }
}

module attributes {stable_mosaic.version = 11 : i64} {
  func.func @mlp_kernel(%arg0: i32, %arg1: memref<8x32xf32, #tpu.memory_space<vmem>>, %arg2: memref<32x256xbf16, #tpu.memory_space<vmem>>, %arg3: memref<1x256xf32, #tpu.memory_space<vmem>>, %arg4: memref<256x16xbf16, #tpu.memory_space<vmem>>, %arg5: memref<1x16xf32, #tpu.memory_space<vmem>>, %arg6: memref<8x16xf32, #tpu.memory_space<vmem>>) attributes {dimension_semantics = [#tpu.dimension_semantics<parallel>], iteration_bounds = array<i64: 1>, scalar_prefetch = 0 : i64, scratch_operands = 0 : i64, tpu.core_type = #tpu.core_type<tc>, window_params = [{transform_indices = @transform_0, window_bounds = array<i64: 8, 32>}, {pipeline_mode = #tpu.pipeline_mode<synchronous>, transform_indices = @transform_1, window_bounds = array<i64: 32, 256>}, {pipeline_mode = #tpu.pipeline_mode<synchronous>, transform_indices = @transform_2, window_bounds = array<i64: 1, 256>}, {pipeline_mode = #tpu.pipeline_mode<synchronous>, transform_indices = @transform_3, window_bounds = array<i64: 256, 16>}, {pipeline_mode = #tpu.pipeline_mode<synchronous>, transform_indices = @transform_4, window_bounds = array<i64: 1, 16>}, {transform_indices = @transform_5, window_bounds = array<i64: 8, 16>}]} {
    %c0 = arith.constant 0 : index
    %c0_0 = arith.constant 0 : index
    %0 = vector.load %arg1[%c0, %c0_0] : memref<8x32xf32, #tpu.memory_space<vmem>>, vector<8x32xf32>
    %1 = arith.truncf %0 : vector<8x32xf32> to vector<8x32xbf16>
    %c0_1 = arith.constant 0 : index
    %c0_2 = arith.constant 0 : index
    %2 = vector.load %arg2[%c0_1, %c0_2] : memref<32x256xbf16, #tpu.memory_space<vmem>>, vector<32x256xbf16>
    %cst = arith.constant dense<0.000000e+00> : vector<8x256xf32>
    %3 = tpu.matmul %1, %2, %cst {dimension_numbers = #tpu.dot_dimension_numbers<[1], [0], [0], [1], [0, 0, 1, 1], [], []>} : vector<8x32xbf16>, vector<32x256xbf16>, vector<8x256xf32> -> vector<8x256xf32>
    %c0_3 = arith.constant 0 : index
    %c0_4 = arith.constant 0 : index
    %4 = vector.load %arg3[%c0_3, %c0_4] : memref<1x256xf32, #tpu.memory_space<vmem>>, vector<1x256xf32>
    %5 = vector.broadcast %4 : vector<1x256xf32> to vector<8x256xf32>
    %6 = arith.addf %3, %5 : vector<8x256xf32>
    %cst_5 = arith.constant 0.000000e+00 : f32
    %7 = vector.broadcast %cst_5 : f32 to vector<8x256xf32>
    %8 = arith.maximumf %6, %7 : vector<8x256xf32>
    %9 = arith.truncf %8 : vector<8x256xf32> to vector<8x256xbf16>
    %c0_6 = arith.constant 0 : index
    %c0_7 = arith.constant 0 : index
    %10 = vector.load %arg4[%c0_6, %c0_7] : memref<256x16xbf16, #tpu.memory_space<vmem>>, vector<256x16xbf16>
    %cst_8 = arith.constant dense<0.000000e+00> : vector<8x16xf32>
    %11 = tpu.matmul %9, %10, %cst_8 {dimension_numbers = #tpu.dot_dimension_numbers<[1], [0], [0], [1], [0, 0, 1, 1], [], []>} : vector<8x256xbf16>, vector<256x16xbf16>, vector<8x16xf32> -> vector<8x16xf32>
    %c0_9 = arith.constant 0 : index
    %c0_10 = arith.constant 0 : index
    %12 = vector.load %arg5[%c0_9, %c0_10] : memref<1x16xf32, #tpu.memory_space<vmem>>, vector<1x16xf32>
    %13 = vector.broadcast %12 : vector<1x16xf32> to vector<8x16xf32>
    %14 = arith.addf %11, %13 : vector<8x16xf32>
    %c0_11 = arith.constant 0 : index
    %c0_12 = arith.constant 0 : index
    %15 = vector.load %arg6[%c0_11, %c0_12] : memref<8x16xf32, #tpu.memory_space<vmem>>, vector<8x16xf32>
    tpu.vector_store %arg6[%c0_11, %c0_12], %14 {strides = array<i32>} : memref<8x16xf32, #tpu.memory_space<vmem>>, vector<8x16xf32>,
    return
  }
  func.func @transform_0(%arg0: i32) -> (i32, i32) {
    %c0_i32 = arith.constant 0 : i32
    %c0_i32_0 = arith.constant 0 : i32
    return %arg0, %c0_i32 : i32, i32
  }
  func.func @transform_1(%arg0: i32) -> (i32, i32) {
    %c0_i32 = arith.constant 0 : i32
    %c0_i32_0 = arith.constant 0 : i32
    %c0_i32_1 = arith.constant 0 : i32
    return %c0_i32, %c0_i32_0 : i32, i32
  }
  func.func @transform_2(%arg0: i32) -> (i32, i32) {
    %c0_i32 = arith.constant 0 : i32
    %c0_i32_0 = arith.constant 0 : i32
    %c0_i32_1 = arith.constant 0 : i32
    return %c0_i32, %c0_i32_0 : i32, i32
  }
  func.func @transform_3(%arg0: i32) -> (i32, i32) {
    %c0_i32 = arith.constant 0 : i32
    %c0_i32_0 = arith.constant 0 : i32
    %c0_i32_1 = arith.constant 0 : i32
    return %c0_i32, %c0_i32_0 : i32, i32
  }
  func.func @transform_4(%arg0: i32) -> (i32, i32) {
    %c0_i32 = arith.constant 0 : i32
    %c0_i32_0 = arith.constant 0 : i32
    %c0_i32_1 = arith.constant 0 : i32
    return %c0_i32, %c0_i32_0 : i32, i32
  }
  func.func @transform_5(%arg0: i32) -> (i32, i32) {
    %c0_i32 = arith.constant 0 : i32
    %c0_i32_0 = arith.constant 0 : i32
    return %arg0, %c0_i32 : i32, i32
  }
}

</mosaic_0001>

<bundles_post_ra>
// kernel: tpu_custom_call.1
= control target key start
LH: loop header
LB: loop body
LE: loop exit
PB: predicated region body
PF: predicated region fallthrough
CT: control target
= control target key end

     0   :  { %v392_v2 = vmov 0   ;;  %vm60_vm0 = vcmask 261120   ;;  %s505_s0 = inlined_call_operand.vmem [shape: f32[8,32], index: 0, kind: input, shape index: {}]   ;;  %s506_s1 = inlined_call_operand.vmem [shape: bf16[32,256], index: 1, kind: input, shape index: {}]   ;;  %s507_s2 = inlined_call_operand.vmem [shape: f32[1,256], index: 2, kind: input, shape index: {}]   ;;  %s508_s3 = inlined_call_operand.vmem [shape: bf16[256,16], index: 3, kind: input, shape index: {}]   ;;  %s509_s4 = inlined_call_operand.vmem [shape: f32[1,16], index: 4, kind: input, shape index: {}]   ;;  %s510_s5 = inlined_call_operand.hbm [shape: f32[8,16], index: 5, kind: output, shape index: {}]  }
   0x1   :  { %v346_v0 = vld [vmem:[%s506_s1 + $0x4] ss:$8 sps:$4 sm:$0xff]   ;;  %v348_v1 = vld [vmem:[%s506_s1] ss:$8 sps:$4 sm:$0xff]   ;;  %96 = vmatprep.mubr.bf16.mxu0 %v392_v2  ;;  %v349_v3 = vld [vmem:[%s506_s1 + $0x14] ss:$8 sps:$4 sm:$0xff]  }
   0x2   :  { %64 = vmatprep.subr.bf16.mxu0 %v346_v0  ;;  %v351_v4 = vld [vmem:[%s506_s1 + $0x10] ss:$8 sps:$4 sm:$0xff]   ;;  %v22_v5 = vld [vmem:[%s505_s0] sm:$0xff]  ;;  %v354_v8 = vld [vmem:[%s508_s3 + $0x48] sm:$0xff]  }
   0x3   :  { %65 = vmatpush1.bf16.msra.mxu0 %v348_v1  ;;  %v352_v6 = vld [vmem:[%s508_s3 + $0x40] sm:$0xff]   ;;  %v23_v9 = vpack.c.bf16 %v22_v5, %v22_v5  ;;  %v355_v10 = vld [vmem:[%s508_s3 + $0x8] sm:$0xff]   ;;  %v356_v11 = vld [vmem:[%s508_s3 + $0x50] sm:$0xff]  }
   0x4   :  { %66 = vmatprep.subr.bf16.mxu0 %v349_v3  ;;  %v353_v7 = vld [vmem:[%s508_s3] sm:$0xff]   ;;  %322 = vmatprep.subr.bf16.mxu1 %v352_v6  ;;  %v357_v12 = vld [vmem:[%s508_s3 + $0x10] sm:$0xff]   ;;  %v358_v13 = vld [vmem:[%s508_s3 + $0x58] sm:$0xff]  }
   0x5   :  { %323 = vmatpush3.bf16.msra.mxu1 %v353_v7  ;;  %v359_v14 = vld [vmem:[%s508_s3 + $0x18] sm:$0xff]   ;;  %v360_v15 = vld [vmem:[%s508_s3 + $0x60] sm:$0xff]  }
   0x6   :  { %324 = vmatprep.subr.bf16.mxu1 %v354_v8  ;;  %v361_v16 = vld [vmem:[%s508_s3 + $0x20] sm:$0xff]  }
   0x7   :  { %67 = vmatpush1.bf16.msra.mxu0 %v351_v4 }
   0x9   :  { %325 = vmatpush3.bf16.msra.mxu1 %v355_v10 }
   0xa   :  { %304 = vmatmul.mubr.msk.bf16.vlgmr.msra.gmra.mrb[0].mxu0 %vm60_vm0, %v23_v9  ;;  %326 = vmatprep.subr.bf16.mxu1 %v356_v11 }
   0xd   :  { %327 = vmatpush3.bf16.msra.mxu1 %v357_v12 }
   0xe   :  { %328 = vmatprep.subr.bf16.mxu1 %v358_v13 }
  0x11   :  { %329 = vmatpush3.bf16.msra.mxu1 %v359_v14 }
  0x12   :  { %10 = vsyncpa [#allocation3], 0  ;;  %330 = vmatprep.subr.bf16.mxu1 %v360_v15  ;;  %v362_v17 = vld [vmem:[%s508_s3 + $0x68] sm:$0xff]   ;;  %v364_v19 = vld [vmem:[%s508_s3 + $0x70] sm:$0xff]   ;;  %v30_v23 = vlaneseq  ;;  %vm284_vm1 = vcmask 130048  }
  0x13   :  { %v363_v18 = vld [vmem:[%s508_s3 + $0x28] sm:$0xff]   ;;  %v365_v20 = vld [vmem:[%s508_s3 + $0x30] sm:$0xff]   ;;  %v366_v21 = vld [vmem:[%s508_s3 + $0x78] sm:$0xff]  }
  0x14   :  { %v367_v22 = vld [vmem:[%s508_s3 + $0x38] sm:$0xff]   ;;  %v31_v24 = vshrl.u32 %v30_v23, 7  ;;  %v28_v26 = vld [vmem:[%s507_s2] sm:$0x3]  ;;  %s393_s2 = smov [#allocation2]  }
  0x15   :  { %331 = vmatpush3.bf16.msra.mxu1 %v361_v16  ;;  %v305_v41 = vld [vmem:[%s509_s4] ss:$0 sm:$0xff]  ;;  %s292_s0 = sshll.u32 %s393_s2, 4  ;;  %s293_s0 = int_to_ptr.vmem [resolvable:$true] %s292_s0 }
  0x16   :  { %332 = vmatprep.subr.bf16.mxu1 %v362_v17  ;;  %v32_v25 = vsub.s32 0, %v31_v24  ;;  %v36_v27 = vsub.s32 1, %v31_v24  ;;  %s368_s10 = scalar_lea.vmem %s293_s0, 128  ;;  %p373_p1 = scmp.lt.s32.totalorder %s293_s0, %s293_s0 }
  0x17   :  { %p369_p0 = scmp.ne.s32.totalorder %s293_s0, %s368_s10  ;;  %p374_p2 = scmp.lt.s32.totalorder %s368_s10, %s368_s10 }
  0x18   :  { %v33_v28 = vrot.slane %v28_v26, %v32_v25  ;;  %v37_v29 = vrot.slane %v28_v26, %v36_v27 }
  0x19   :  { %333 = vmatpush3.bf16.msra.mxu1 %v363_v18  ;;  %p375_p3 = por %p374_p2, %p373_p1 }
  0x1a   :  { %334 = vmatprep.subr.bf16.mxu1 %v364_v19 }
  0x1b   :  { %p376_p4 = pnand %p375_p3, %p369_p0 }
  0x1d   :  { %335 = vmatpush3.bf16.msra.mxu1 %v365_v20 }
  0x1e   :  { %336 = vmatprep.subr.bf16.mxu1 %v366_v21 }
  0x21   :  { %337 = vmatpush3.bf16.msra.mxu1 %v367_v22 }
  0xdd   :  { %v98_v30 = vpop.f32.mrb[0].mxu0 }
  0xde   :  { %v99_v31 = vadd.f32 %v98_v30, %v33_v28  ;;  %v100_v32 = vpop.f32.mrb[1].mxu0 }
  0xdf   :  { %v101_v33 = vadd.f32 %v100_v32, %v37_v29  ;;  %v102_v34 = vpop.f32.mrb[2].mxu0 }
  0xe0   :  { %v105_v35 = vmax.f32 %v99_v31, 0.0  ;;  %v103_v36 = vpop.f32.mrb[3].mxu0 }
  0xe1   :  { %v106_v37 = vmax.f32 %v101_v33, 0.0 }
  0xe2   :  { %v107_v39 = vpack.c.bf16 %v105_v35, %v105_v35 }
  0xe3   :  { %v108_v38 = vpack.c.bf16 %v106_v37, %v106_v37 }
  0xe5   :  { %276 = vmatprep.mubr.bf16.mxu1 %v108_v38 }
  0xe6   :  { %277 = vmatmul.mubr.bf16.vlgmr.msra.gmra.mrb[0].mxu1 %v107_v39 }
 0x1b9   :  { %v338_v40 = vpop.f32.mrb[0].mxu1 }
 0x1ba   :  { %v339_v42 = vpop.f32.mrb[1].mxu1 }
 0x1bb   :  { %v340_v43 = vadd.f32 %v339_v42, %v338_v40  ;;  %v341_v44 = vpop.f32.mrb[2].mxu1 }
 0x1bc   :  { %v342_v45 = vpop.f32.mrb[3].mxu1 }
 0x1bd   :  { %v279_v46 = vadd.f32 %v340_v43, %v305_v41 }
 0x1bf   :  { %285 = vst.msk [vmem:[#allocation2] sm:$0xff] %vm284_vm1, %v279_v46 }
 0x1c0   :  { %379 = shalt.err (!%p376_p4)
}
 0x1c1   :  { %s380_s4 = scalar_lea.hbm %s510_s5, 128 }
 0x1c2   :  { %p381_p5 = scmp.ne.s32.totalorder %s510_s5, %s380_s4  ;;  %p384_p6 = scmp.lt.u32.totalorder %s380_s4, %s510_s5 }
 0x1c4   :  { %p386_p7 = pnand %p384_p6, %p381_p5 }
 0x1c6   :  { %389 = shalt.err (!%p386_p7)
}
 0x1c7   :  { %295 = dma.vmem_to_hbm [thread:$0]  %s293_s0, 128, %s510_s5, [#allocation3]  }
 0x1c8   :  { %390 = dma.done.wait [#allocation3], 128  }
 0x1c9   :  { %391 = vsyncadd [#allocation3], 4294967168 }
 0x1ca   :  { %299 = vsyncpa [#allocation3], 1 }

// kernel: tpu_custom_call.1
= control target key start
LH: loop header
LB: loop body
LE: loop exit
PB: predicated region body
PF: predicated region fallthrough
CT: control target
= control target key end

     0   :  { %v392_v2 = vmov 0   ;;  %vm60_vm0 = vcmask 261120   ;;  %s505_s0 = inlined_call_operand.vmem [shape: f32[8,32], index: 0, kind: input, shape index: {}]   ;;  %s506_s1 = inlined_call_operand.vmem [shape: bf16[32,256], index: 1, kind: input, shape index: {}]   ;;  %s507_s2 = inlined_call_operand.vmem [shape: f32[1,256], index: 2, kind: input, shape index: {}]   ;;  %s508_s3 = inlined_call_operand.vmem [shape: bf16[256,16], index: 3, kind: input, shape index: {}]   ;;  %s509_s4 = inlined_call_operand.vmem [shape: f32[1,16], index: 4, kind: input, shape index: {}]   ;;  %s510_s5 = inlined_call_operand.hbm [shape: f32[8,16], index: 5, kind: output, shape index: {}]  }
   0x1   :  { %v346_v0 = vld [vmem:[%s506_s1 + $0x4] ss:$8 sps:$4 sm:$0xff]   ;;  %v348_v1 = vld [vmem:[%s506_s1] ss:$8 sps:$4 sm:$0xff]   ;;  %96 = vmatprep.mubr.bf16.mxu0 %v392_v2  ;;  %v349_v3 = vld [vmem:[%s506_s1 + $0x14] ss:$8 sps:$4 sm:$0xff]  }
   0x2   :  { %64 = vmatprep.subr.bf16.mxu0 %v346_v0  ;;  %v351_v4 = vld [vmem:[%s506_s1 + $0x10] ss:$8 sps:$4 sm:$0xff]   ;;  %v22_v5 = vld [vmem:[%s505_s0] sm:$0xff]  ;;  %v354_v8 = vld [vmem:[%s508_s3 + $0x48] sm:$0xff]  }
   0x3   :  { %65 = vmatpush1.bf16.msra.mxu0 %v348_v1  ;;  %v352_v6 = vld [vmem:[%s508_s3 + $0x40] sm:$0xff]   ;;  %v23_v9 = vpack.c.bf16 %v22_v5, %v22_v5  ;;  %v355_v10 = vld [vmem:[%s508_s3 + $0x8] sm:$0xff]   ;;  %v356_v11 = vld [vmem:[%s508_s3 + $0x50] sm:$0xff]  }
   0x4   :  { %66 = vmatprep.subr.bf16.mxu0 %v349_v3  ;;  %v353_v7 = vld [vmem:[%s508_s3] sm:$0xff]   ;;  %322 = vmatprep.subr.bf16.mxu1 %v352_v6  ;;  %v357_v12 = vld [vmem:[%s508_s3 + $0x10] sm:$0xff]   ;;  %v358_v13 = vld [vmem:[%s508_s3 + $0x58] sm:$0xff]  }
   0x5   :  { %323 = vmatpush3.bf16.msra.mxu1 %v353_v7  ;;  %v359_v14 = vld [vmem:[%s508_s3 + $0x18] sm:$0xff]   ;;  %v360_v15 = vld [vmem:[%s508_s3 + $0x60] sm:$0xff]  }
   0x6   :  { %324 = vmatprep.subr.bf16.mxu1 %v354_v8  ;;  %v361_v16 = vld [vmem:[%s508_s3 + $0x20] sm:$0xff]  }
   0x7   :  { %67 = vmatpush1.bf16.msra.mxu0 %v351_v4 }
   0x9   :  { %325 = vmatpush3.bf16.msra.mxu1 %v355_v10 }
   0xa   :  { %304 = vmatmul.mubr.msk.bf16.vlgmr.msra.gmra.mrb[0].mxu0 %vm60_vm0, %v23_v9  ;;  %326 = vmatprep.subr.bf16.mxu1 %v356_v11 }
   0xd   :  { %327 = vmatpush3.bf16.msra.mxu1 %v357_v12 }
   0xe   :  { %328 = vmatprep.subr.bf16.mxu1 %v358_v13 }
  0x11   :  { %329 = vmatpush3.bf16.msra.mxu1 %v359_v14 }
  0x12   :  { %10 = vsyncpa [#allocation3], 0  ;;  %330 = vmatprep.subr.bf16.mxu1 %v360_v15  ;;  %v362_v17 = vld [vmem:[%s508_s3 + $0x68] sm:$0xff]   ;;  %v364_v19 = vld [vmem:[%s508_s3 + $0x70] sm:$0xff]   ;;  %v30_v23 = vlaneseq  ;;  %vm284_vm1 = vcmask 130048  }
  0x13   :  { %v363_v18 = vld [vmem:[%s508_s3 + $0x28] sm:$0xff]   ;;  %v365_v20 = vld [vmem:[%s508_s3 + $0x30] sm:$0xff]   ;;  %v366_v21 = vld [vmem:[%s508_s3 + $0x78] sm:$0xff]  }
  0x14   :  { %v367_v22 = vld [vmem:[%s508_s3 + $0x38] sm:$0xff]   ;;  %v31_v24 = vshrl.u32 %v30_v23, 7  ;;  %v28_v26 = vld [vmem:[%s507_s2] sm:$0x3]  ;;  %s393_s2 = smov [#allocation2]  }
  0x15   :  { %331 = vmatpush3.bf16.msra.mxu1 %v361_v16  ;;  %v305_v41 = vld [vmem:[%s509_s4] ss:$0 sm:$0xff]  ;;  %s292_s0 = sshll.u32 %s393_s2, 4  ;;  %s293_s0 = int_to_ptr.vmem [resolvable:$true] %s292_s0 }
  0x16   :  { %332 = vmatprep.subr.bf16.mxu1 %v362_v17  ;;  %v32_v25 = vsub.s32 0, %v31_v24  ;;  %v36_v27 = vsub.s32 1, %v31_v24  ;;  %s368_s10 = scalar_lea.vmem %s293_s0, 128  ;;  %p373_p1 = scmp.lt.s32.totalorder %s293_s0, %s293_s0 }
  0x17   :  { %p369_p0 = scmp.ne.s32.totalorder %s293_s0, %s368_s10  ;;  %p374_p2 = scmp.lt.s32.totalorder %s368_s10, %s368_s10 }
  0x18   :  { %v33_v28 = vrot.slane %v28_v26, %v32_v25  ;;  %v37_v29 = vrot.slane %v28_v26, %v36_v27 }
  0x19   :  { %333 = vmatpush3.bf16.msra.mxu1 %v363_v18  ;;  %p375_p3 = por %p374_p2, %p373_p1 }
  0x1a   :  { %334 = vmatprep.subr.bf16.mxu1 %v364_v19 }
  0x1b   :  { %p376_p4 = pnand %p375_p3, %p369_p0 }
  0x1d   :  { %335 = vmatpush3.bf16.msra.mxu1 %v365_v20 }
  0x1e   :  { %336 = vmatprep.subr.bf16.mxu1 %v366_v21 }
  0x21   :  { %337 = vmatpush3.bf16.msra.mxu1 %v367_v22 }
  0xdd   :  { %v98_v30 = vpop.f32.mrb[0].mxu0 }
  0xde   :  { %v99_v31 = vadd.f32 %v98_v30, %v33_v28  ;;  %v100_v32 = vpop.f32.mrb[1].mxu0 }
  0xdf   :  { %v101_v33 = vadd.f32 %v100_v32, %v37_v29  ;;  %v102_v34 = vpop.f32.mrb[2].mxu0 }
  0xe0   :  { %v105_v35 = vmax.f32 %v99_v31, 0.0  ;;  %v103_v36 = vpop.f32.mrb[3].mxu0 }
  0xe1   :  { %v106_v37 = vmax.f32 %v101_v33, 0.0 }
  0xe2   :  { %v107_v39 = vpack.c.bf16 %v105_v35, %v105_v35 }
  0xe3   :  { %v108_v38 = vpack.c.bf16 %v106_v37, %v106_v37 }
  0xe5   :  { %276 = vmatprep.mubr.bf16.mxu1 %v108_v38 }
  0xe6   :  { %277 = vmatmul.mubr.bf16.vlgmr.msra.gmra.mrb[0].mxu1 %v107_v39 }
 0x1b9   :  { %v338_v40 = vpop.f32.mrb[0].mxu1 }
 0x1ba   :  { %v339_v42 = vpop.f32.mrb[1].mxu1 }
 0x1bb   :  { %v340_v43 = vadd.f32 %v339_v42, %v338_v40  ;;  %v341_v44 = vpop.f32.mrb[2].mxu1 }
 0x1bc   :  { %v342_v45 = vpop.f32.mrb[3].mxu1 }
 0x1bd   :  { %v279_v46 = vadd.f32 %v340_v43, %v305_v41 }
 0x1bf   :  { %285 = vst.msk [vmem:[#allocation2] sm:$0xff] %vm284_vm1, %v279_v46 }
 0x1c0   :  { %379 = shalt.err (!%p376_p4)
}
 0x1c1   :  { %s380_s4 = scalar_lea.hbm %s510_s5, 128 }
 0x1c2   :  { %p381_p5 = scmp.ne.s32.totalorder %s510_s5, %s380_s4  ;;  %p384_p6 = scmp.lt.u32.totalorder %s380_s4, %s510_s5 }
 0x1c4   :  { %p386_p7 = pnand %p384_p6, %p381_p5 }
 0x1c6   :  { %389 = shalt.err (!%p386_p7)
}
 0x1c7   :  { %295 = dma.vmem_to_hbm [thread:$0]  %s293_s0, 128, %s510_s5, [#allocation3]  }
 0x1c8   :  { %390 = dma.done.wait [#allocation3], 128  }
 0x1c9   :  { %391 = vsyncadd [#allocation3], 4294967168 }
 0x1ca   :  { %299 = vsyncpa [#allocation3], 1 }

</bundles_post_ra>
